<compile_context>
chip_gen: v7x
topology: tpu7x:2x2x1
jax: 0.10.0
libtpu: 0.0.40
codegen_flags: <defaults>
</compile_context>

<pallas_src>
import jax
import jax.numpy as jnp
import numpy as np
from jax.experimental import pallas as pl
from jax.experimental.pallas import tpu as pltpu

NEG_SLOPE = 0.01   # nn.LeakyReLU default
BN_EPS = 1e-5      # nn.BatchNorm1d default
LANE = 128         # pad all flattened layer dims to multiples of this


# ----------------------------------------------------------------------------
# Fused Pallas kernel: 6 matmuls + 5 LeakyReLUs over one batch block.
#   refs = (G_1, s_1, G_2, s_2, ..., G_6, s_6, out)
#   G_l : [P_in_l, P_out_l]  bf16   (BN/bias-folded block-Toeplitz operator)
#   s_l : [1, P_out_l]       f32    (folded bias + BN shift, zero on padding)
# ----------------------------------------------------------------------------
def _cnnae_kernel(x_ref, *refs):
    o_ref = refs[-1]
    op_refs = refs[:-1]
    n_layers = len(op_refs) // 2
    h = x_ref[...]                                # [Nb, P0] bf16
    y = None
    for li in range(n_layers):                    # static unroll, 6 layers
        g = op_refs[2 * li][...]                  # bf16 [P_in, P_out]
        s = op_refs[2 * li + 1][...]              # f32  [1, P_out]
        y = jnp.dot(h, g, preferred_element_type=jnp.float32) + s
        if li < n_layers - 1:
            y = jnp.where(y >= 0.0, y, NEG_SLOPE * y)
            h = y.astype(jnp.bfloat16)            # next layer's MXU input
    o_ref[...] = y                                # lane-dense f32 [Nb, P_last]


# ----------------------------------------------------------------------------
# Host-side (static, tiny) preparation: BN folding + per-layer operator build
# ----------------------------------------------------------------------------
def _round_up(x, m):
    return (x + m - 1) // m * m


def fold_bn(bn, c):
    if bn is None:
        return jnp.ones((c,), jnp.float32), jnp.zeros((c,), jnp.float32)
    scale = bn["gamma"] / jnp.sqrt(bn["var"] + BN_EPS)
    shift = bn["beta"] - bn["mean"] * scale
    return scale, shift


def _selection_conv(lin, lout, k, stride, padding):
    # A[t, li, lo] = 1 iff input li feeds output lo through tap t (Conv1d).
    a = np.zeros((k, lin, lout), np.float32)
    for t in range(k):
        for lo in range(lout):
            li = stride * lo + t - padding
            if 0 <= li < lin:
                a[t, li, lo] = 1.0
    return a


def _selection_convt(lin, lout, k, stride, padding):
    # A[t, li, lo] = 1 iff input li feeds output lo through tap t (ConvTranspose1d).
    a = np.zeros((k, lin, lout), np.float32)
    for t in range(k):
        for li in range(lin):
            lo = stride * li + t - padding
            if 0 <= lo < lout:
                a[t, li, lo] = 1.0
    return a


def _prep_conv(w, b, bn, lin, stride=2, padding=2):
    # w: [Cout, Cin, K] (PyTorch Conv1d layout)
    cout, cin, k = w.shape
    lout = (lin + 2 * padding - k) // stride + 1
    scale, shift = fold_bn(bn, cout)
    w_s = w * scale[:, None, None]
    a = jnp.asarray(_selection_conv(lin, lout, k, stride, padding))
    # G[ci, li, co, lo] = sum_t W'[co, ci, t] * A[t, li, lo]
    g = jnp.einsum("oit,tlm->ilom", w_s, a).reshape(cin * lin, cout * lout)
    sh = jnp.broadcast_to((b * scale + shift)[:, None], (cout, lout)).reshape(1, -1)
    return g, sh, lout


def _prep_convt(w, b, bn, lin, stride=2, padding=2, output_padding=0):
    # w: [Cin, Cout, K] (PyTorch ConvTranspose1d layout)
    cin, cout, k = w.shape
    lout = (lin - 1) * stride - 2 * padding + k + output_padding
    scale, shift = fold_bn(bn, cout)
    w_s = w * scale[None, :, None]
    a = jnp.asarray(_selection_convt(lin, lout, k, stride, padding))
    # G[ci, li, co, lo] = sum_t W'[ci, co, t] * A[t, li, lo]
    g = jnp.einsum("iot,tlm->ilom", w_s, a).reshape(cin * lin, cout * lout)
    sh = jnp.broadcast_to((b * scale + shift)[:, None], (cout, lout)).reshape(1, -1)
    return g, sh, lout


def _pad_op(g, sh):
    # Zero-pad operator + shift so every flattened layer dim is a multiple of 128.
    p_in = _round_up(g.shape[0], LANE)
    p_out = _round_up(g.shape[1], LANE)
    g_p = jnp.zeros((p_in, p_out), jnp.float32).at[: g.shape[0], : g.shape[1]].set(g)
    sh_p = jnp.zeros((1, p_out), jnp.float32).at[:, : sh.shape[1]].set(sh)
    return g_p.astype(jnp.bfloat16), sh_p


# ----------------------------------------------------------------------------
# CNNAE forward: one fused pallas_call, grid over batch blocks
# ----------------------------------------------------------------------------
def cnn_ae_forward(x, p, nb_max=128):
    n, cin, lin = x.shape

    layer_ops = []
    l = lin
    g, s, l = _prep_conv(p["e1_w"], p["e1_b"], p["e1_bn"], l); layer_ops.append((g, s))
    g, s, l = _prep_conv(p["e2_w"], p["e2_b"], p["e2_bn"], l); layer_ops.append((g, s))
    g, s, l = _prep_conv(p["e3_w"], p["e3_b"], p["e3_bn"], l); layer_ops.append((g, s))
    g, s, l = _prep_convt(p["d1_w"], p["d1_b"], p["d1_bn"], l, output_padding=0); layer_ops.append((g, s))
    g, s, l = _prep_convt(p["d2_w"], p["d2_b"], p["d2_bn"], l, output_padding=1); layer_ops.append((g, s))
    g, s, l = _prep_convt(p["d3_w"], p["d3_b"], None,        l, output_padding=1); layer_ops.append((g, s))
    cout_last = p["d3_w"].shape[1]
    lout_last = l

    padded = [_pad_op(g, s) for (g, s) in layer_ops]
    p0 = padded[0][0].shape[0]
    p_last = padded[-1][0].shape[1]

    # Batch blocking: batch rows are the matmul M (sublane) dimension.
    nb = min(_round_up(n, 8), nb_max)
    n_pad = _round_up(n, nb)
    x_flat = x.reshape(n, cin * lin).astype(jnp.bfloat16)
    x_pad = jnp.zeros((n_pad, p0), jnp.bfloat16).at[:n, : cin * lin].set(x_flat)

    flat_ops = []
    for g, s in padded:
        flat_ops += [g, s]

    in_specs = [pl.BlockSpec((nb, p0), lambda b: (b, 0))]
    for arr in flat_ops:
        in_specs.append(pl.BlockSpec(arr.shape, lambda b: (0, 0)))   # VMEM-resident

    # Advisory cost estimate (only the 6 real matmuls).
    flops = sum(2 * n_pad * g.shape[0] * g.shape[1] for g, _ in padded)
    bytes_accessed = (x_pad.size * 2 + n_pad * p_last * 4
                      + sum(g.size * 2 + s.size * 4 for g, s in padded))

    out = pl.pallas_call(
        _cnnae_kernel,
        out_shape=jax.ShapeDtypeStruct((n_pad, p_last), jnp.float32),
        grid=(n_pad // nb,),
        in_specs=in_specs,
        out_specs=pl.BlockSpec((nb, p_last), lambda b: (b, 0)),
        compiler_params=pltpu.CompilerParams(dimension_semantics=("parallel",)),
        cost_estimate=pl.CostEstimate(flops=int(flops), transcendentals=0,
                                      bytes_accessed=int(bytes_accessed)),
    )(x_pad, *flat_ops)

    return out[:n, : cout_last * lout_last].reshape(n, cout_last, lout_last)


# ----------------------------------------------------------------------------
# Pure-JAX f32 reference (lax.conv_general_dilated) for validation
# ----------------------------------------------------------------------------
def _ref_conv(x, w, b, stride=2, padding=2):
    y = jax.lax.conv_general_dilated(
        x, w, (stride,), [(padding, padding)], dimension_numbers=("NCH", "OIH", "NCH"))
    return y + b[None, :, None]


def _ref_convt(x, w, b, stride=2, padding=2, output_padding=0):
    k = w.shape[-1]
    w_eq = jnp.flip(jnp.transpose(w, (1, 0, 2)), axis=-1)
    y = jax.lax.conv_general_dilated(
        x, w_eq, (1,), [(k - 1 - padding, k - 1 - padding + output_padding)],
        lhs_dilation=(stride,), dimension_numbers=("NCH", "OIH", "NCH"))
    return y + b[None, :, None]


def _ref_bn(x, bn):
    return ((x - bn["mean"][None, :, None]) / jnp.sqrt(bn["var"][None, :, None] + BN_EPS)
            * bn["gamma"][None, :, None] + bn["beta"][None, :, None])


def _ref_lrelu(x):
    return jnp.where(x >= 0, x, NEG_SLOPE * x)


def cnn_ae_reference(x, p):
    h = _ref_lrelu(_ref_bn(_ref_conv(x, p["e1_w"], p["e1_b"]), p["e1_bn"]))
    h = _ref_lrelu(_ref_bn(_ref_conv(h, p["e2_w"], p["e2_b"]), p["e2_bn"]))
    h = _ref_lrelu(_ref_bn(_ref_conv(h, p["e3_w"], p["e3_b"]), p["e3_bn"]))
    h = _ref_lrelu(_ref_bn(_ref_convt(h, p["d1_w"], p["d1_b"], output_padding=0), p["d1_bn"]))
    h = _ref_lrelu(_ref_bn(_ref_convt(h, p["d2_w"], p["d2_b"], output_padding=1), p["d2_bn"]))
    h = _ref_convt(h, p["d3_w"], p["d3_b"], output_padding=1)
    return h


# ----------------------------------------------------------------------------
# Deterministic parameter init
# ----------------------------------------------------------------------------
def _make_bn(key, c):
    k1, k2, k3, k4 = jax.random.split(key, 4)
    return dict(
        gamma=1.0 + 0.1 * jax.random.normal(k1, (c,), jnp.float32),
        beta=0.1 * jax.random.normal(k2, (c,), jnp.float32),
        mean=0.1 * jax.random.normal(k3, (c,), jnp.float32),
        var=0.5 + jax.random.uniform(k4, (c,), jnp.float32),
    )


def init_params(key, in_channels=3, n_c=16, k=5):
    keys = jax.random.split(key, 16)
    nrm = lambda kk, shape: 0.1 * jax.random.normal(kk, shape, jnp.float32)
    p = {}
    # encoder: Conv1d weights [Cout, Cin, K]
    p["e1_w"] = nrm(keys[0], (n_c, in_channels, k));      p["e1_b"] = nrm(keys[1], (n_c,))
    p["e1_bn"] = _make_bn(keys[2], n_c)
    p["e2_w"] = nrm(keys[3], (2 * n_c, n_c, k));          p["e2_b"] = nrm(keys[4], (2 * n_c,))
    p["e2_bn"] = _make_bn(keys[5], 2 * n_c)
    p["e3_w"] = nrm(keys[6], (4 * n_c, 2 * n_c, k));      p["e3_b"] = nrm(keys[7], (4 * n_c,))
    p["e3_bn"] = _make_bn(keys[8], 4 * n_c)
    # decoder: ConvTranspose1d weights [Cin, Cout, K]
    p["d1_w"] = nrm(keys[9], (4 * n_c, 2 * n_c, k));      p["d1_b"] = nrm(keys[10], (2 * n_c,))
    p["d1_bn"] = _make_bn(keys[11], 2 * n_c)
    p["d2_w"] = nrm(keys[12], (2 * n_c, n_c, k));         p["d2_b"] = nrm(keys[13], (n_c,))
    p["d2_bn"] = _make_bn(keys[14], n_c)
    p["d3_w"] = nrm(keys[15], (n_c, in_channels, k))
    p["d3_b"] = jnp.zeros((in_channels,), jnp.float32)
    return p


if __name__ == "__main__":
    key = jax.random.PRNGKey(0)
    k_x, k_p = jax.random.split(key)

    in_channels, n_channels, kernel_size = 3, 16, 5
    batch, seq_len = 2, 32

    x = jax.random.normal(k_x, (batch, in_channels, seq_len), jnp.float32)
    params = init_params(k_p, in_channels, n_channels, kernel_size)

    out = jax.block_until_ready(cnn_ae_forward(x, params))
    ref = jax.block_until_ready(cnn_ae_reference(x, params))

    # bf16 MXU inputs (operators + inter-layer activations) with f32 accumulation;
    # rounding compounds over 6 layers, hence the loosened tolerance.
    np.testing.assert_allclose(np.asarray(out), np.asarray(ref), rtol=5e-2, atol=5e-2)

    print("KERNEL_OK")
</pallas_src>

<mosaic_0001>
module attributes {stable_mosaic.version = 11 : i64} {
  func.func @_cnnae_kernel(%arg0: i32, %arg1: memref<8x128xbf16, #tpu.memory_space<vmem>>, %arg2: memref<128x256xbf16, #tpu.memory_space<vmem>>, %arg3: memref<1x256xf32, #tpu.memory_space<vmem>>, %arg4: memref<256x256xbf16, #tpu.memory_space<vmem>>, %arg5: memref<1x256xf32, #tpu.memory_space<vmem>>, %arg6: memref<256x256xbf16, #tpu.memory_space<vmem>>, %arg7: memref<1x256xf32, #tpu.memory_space<vmem>>, %arg8: memref<256x256xbf16, #tpu.memory_space<vmem>>, %arg9: memref<1x256xf32, #tpu.memory_space<vmem>>, %arg10: memref<256x256xbf16, #tpu.memory_space<vmem>>, %arg11: memref<1x256xf32, #tpu.memory_space<vmem>>, %arg12: memref<256x128xbf16, #tpu.memory_space<vmem>>, %arg13: memref<1x128xf32, #tpu.memory_space<vmem>>, %arg14: memref<8x128xf32, #tpu.memory_space<vmem>>) attributes {dimension_semantics = [#tpu.dimension_semantics<parallel>], iteration_bounds = array<i64: 1>, scalar_prefetch = 0 : i64, scratch_operands = 0 : i64, tpu.core_type = #tpu.core_type<tc>, window_params = [{transform_indices = @transform_0, window_bounds = array<i64: 8, 128>}, {pipeline_mode = #tpu.pipeline_mode<synchronous>, transform_indices = @transform_1, window_bounds = array<i64: 128, 256>}, {pipeline_mode = #tpu.pipeline_mode<synchronous>, transform_indices = @transform_2, window_bounds = array<i64: 1, 256>}, {pipeline_mode = #tpu.pipeline_mode<synchronous>, transform_indices = @transform_3, window_bounds = array<i64: 256, 256>}, {pipeline_mode = #tpu.pipeline_mode<synchronous>, transform_indices = @transform_4, window_bounds = array<i64: 1, 256>}, {pipeline_mode = #tpu.pipeline_mode<synchronous>, transform_indices = @transform_5, window_bounds = array<i64: 256, 256>}, {pipeline_mode = #tpu.pipeline_mode<synchronous>, transform_indices = @transform_6, window_bounds = array<i64: 1, 256>}, {pipeline_mode = #tpu.pipeline_mode<synchronous>, transform_indices = @transform_7, window_bounds = array<i64: 256, 256>}, {pipeline_mode = #tpu.pipeline_mode<synchronous>, transform_indices = @transform_8, window_bounds = array<i64: 1, 256>}, {pipeline_mode = #tpu.pipeline_mode<synchronous>, transform_indices = @transform_9, window_bounds = array<i64: 256, 256>}, {pipeline_mode = #tpu.pipeline_mode<synchronous>, transform_indices = @transform_10, window_bounds = array<i64: 1, 256>}, {pipeline_mode = #tpu.pipeline_mode<synchronous>, transform_indices = @transform_11, window_bounds = array<i64: 256, 128>}, {pipeline_mode = #tpu.pipeline_mode<synchronous>, transform_indices = @transform_12, window_bounds = array<i64: 1, 128>}, {transform_indices = @transform_13, window_bounds = array<i64: 8, 128>}]} {
    %c0 = arith.constant 0 : index
    %c0_0 = arith.constant 0 : index
    %0 = vector.load %arg1[%c0, %c0_0] : memref<8x128xbf16, #tpu.memory_space<vmem>>, vector<8x128xbf16>
    %c0_1 = arith.constant 0 : index
    %c0_2 = arith.constant 0 : index
    %1 = vector.load %arg2[%c0_1, %c0_2] : memref<128x256xbf16, #tpu.memory_space<vmem>>, vector<128x256xbf16>
    %c0_3 = arith.constant 0 : index
    %c0_4 = arith.constant 0 : index
    %2 = vector.load %arg3[%c0_3, %c0_4] : memref<1x256xf32, #tpu.memory_space<vmem>>, vector<1x256xf32>
    %cst = arith.constant dense<0.000000e+00> : vector<8x256xf32>
    %3 = tpu.matmul %0, %1, %cst {dimension_numbers = #tpu.dot_dimension_numbers<[1], [0], [0], [1], [0, 0, 1, 1], [], []>} : vector<8x128xbf16>, vector<128x256xbf16>, vector<8x256xf32> -> vector<8x256xf32>
    %4 = vector.broadcast %2 : vector<1x256xf32> to vector<8x256xf32>
    %5 = arith.addf %3, %4 : vector<8x256xf32>
    %cst_5 = arith.constant 0.000000e+00 : f32
    %6 = vector.broadcast %cst_5 : f32 to vector<8x256xf32>
    %7 = arith.cmpf oge, %5, %6 : vector<8x256xf32>
    %cst_6 = arith.constant 0.00999999977 : f32
    %8 = vector.broadcast %cst_6 : f32 to vector<8x256xf32>
    %9 = arith.mulf %8, %5 : vector<8x256xf32>
    %10 = arith.select %7, %5, %9 : vector<8x256xi1>, vector<8x256xf32>
    %11 = arith.truncf %10 : vector<8x256xf32> to vector<8x256xbf16>
    %c0_7 = arith.constant 0 : index
    %c0_8 = arith.constant 0 : index
    %12 = vector.load %arg4[%c0_7, %c0_8] : memref<256x256xbf16, #tpu.memory_space<vmem>>, vector<256x256xbf16>
    %c0_9 = arith.constant 0 : index
    %c0_10 = arith.constant 0 : index
    %13 = vector.load %arg5[%c0_9, %c0_10] : memref<1x256xf32, #tpu.memory_space<vmem>>, vector<1x256xf32>
    %cst_11 = arith.constant dense<0.000000e+00> : vector<8x256xf32>
    %14 = tpu.matmul %11, %12, %cst_11 {dimension_numbers = #tpu.dot_dimension_numbers<[1], [0], [0], [1], [0, 0, 1, 1], [], []>} : vector<8x256xbf16>, vector<256x256xbf16>, vector<8x256xf32> -> vector<8x256xf32>
    %15 = vector.broadcast %13 : vector<1x256xf32> to vector<8x256xf32>
    %16 = arith.addf %14, %15 : vector<8x256xf32>
    %cst_12 = arith.constant 0.000000e+00 : f32
    %17 = vector.broadcast %cst_12 : f32 to vector<8x256xf32>
    %18 = arith.cmpf oge, %16, %17 : vector<8x256xf32>
    %cst_13 = arith.constant 0.00999999977 : f32
    %19 = vector.broadcast %cst_13 : f32 to vector<8x256xf32>
    %20 = arith.mulf %19, %16 : vector<8x256xf32>
    %21 = arith.select %18, %16, %20 : vector<8x256xi1>, vector<8x256xf32>
    %22 = arith.truncf %21 : vector<8x256xf32> to vector<8x256xbf16>
    %c0_14 = arith.constant 0 : index
    %c0_15 = arith.constant 0 : index
    %23 = vector.load %arg6[%c0_14, %c0_15] : memref<256x256xbf16, #tpu.memory_space<vmem>>, vector<256x256xbf16>
    %c0_16 = arith.constant 0 : index
    %c0_17 = arith.constant 0 : index
    %24 = vector.load %arg7[%c0_16, %c0_17] : memref<1x256xf32, #tpu.memory_space<vmem>>, vector<1x256xf32>
    %cst_18 = arith.constant dense<0.000000e+00> : vector<8x256xf32>
    %25 = tpu.matmul %22, %23, %cst_18 {dimension_numbers = #tpu.dot_dimension_numbers<[1], [0], [0], [1], [0, 0, 1, 1], [], []>} : vector<8x256xbf16>, vector<256x256xbf16>, vector<8x256xf32> -> vector<8x256xf32>
    %26 = vector.broadcast %24 : vector<1x256xf32> to vector<8x256xf32>
    %27 = arith.addf %25, %26 : vector<8x256xf32>
    %cst_19 = arith.constant 0.000000e+00 : f32
    %28 = vector.broadcast %cst_19 : f32 to vector<8x256xf32>
    %29 = arith.cmpf oge, %27, %28 : vector<8x256xf32>
    %cst_20 = arith.constant 0.00999999977 : f32
    %30 = vector.broadcast %cst_20 : f32 to vector<8x256xf32>
    %31 = arith.mulf %30, %27 : vector<8x256xf32>
    %32 = arith.select %29, %27, %31 : vector<8x256xi1>, vector<8x256xf32>
    %33 = arith.truncf %32 : vector<8x256xf32> to vector<8x256xbf16>
    %c0_21 = arith.constant 0 : index
    %c0_22 = arith.constant 0 : index
    %34 = vector.load %arg8[%c0_21, %c0_22] : memref<256x256xbf16, #tpu.memory_space<vmem>>, vector<256x256xbf16>
    %c0_23 = arith.constant 0 : index
    %c0_24 = arith.constant 0 : index
    %35 = vector.load %arg9[%c0_23, %c0_24] : memref<1x256xf32, #tpu.memory_space<vmem>>, vector<1x256xf32>
    %cst_25 = arith.constant dense<0.000000e+00> : vector<8x256xf32>
    %36 = tpu.matmul %33, %34, %cst_25 {dimension_numbers = #tpu.dot_dimension_numbers<[1], [0], [0], [1], [0, 0, 1, 1], [], []>} : vector<8x256xbf16>, vector<256x256xbf16>, vector<8x256xf32> -> vector<8x256xf32>
    %37 = vector.broadcast %35 : vector<1x256xf32> to vector<8x256xf32>
    %38 = arith.addf %36, %37 : vector<8x256xf32>
    %cst_26 = arith.constant 0.000000e+00 : f32
    %39 = vector.broadcast %cst_26 : f32 to vector<8x256xf32>
    %40 = arith.cmpf oge, %38, %39 : vector<8x256xf32>
    %cst_27 = arith.constant 0.00999999977 : f32
    %41 = vector.broadcast %cst_27 : f32 to vector<8x256xf32>
    %42 = arith.mulf %41, %38 : vector<8x256xf32>
    %43 = arith.select %40, %38, %42 : vector<8x256xi1>, vector<8x256xf32>
    %44 = arith.truncf %43 : vector<8x256xf32> to vector<8x256xbf16>
    %c0_28 = arith.constant 0 : index
    %c0_29 = arith.constant 0 : index
    %45 = vector.load %arg10[%c0_28, %c0_29] : memref<256x256xbf16, #tpu.memory_space<vmem>>, vector<256x256xbf16>
    %c0_30 = arith.constant 0 : index
    %c0_31 = arith.constant 0 : index
    %46 = vector.load %arg11[%c0_30, %c0_31] : memref<1x256xf32, #tpu.memory_space<vmem>>, vector<1x256xf32>
    %cst_32 = arith.constant dense<0.000000e+00> : vector<8x256xf32>
    %47 = tpu.matmul %44, %45, %cst_32 {dimension_numbers = #tpu.dot_dimension_numbers<[1], [0], [0], [1], [0, 0, 1, 1], [], []>} : vector<8x256xbf16>, vector<256x256xbf16>, vector<8x256xf32> -> vector<8x256xf32>
    %48 = vector.broadcast %46 : vector<1x256xf32> to vector<8x256xf32>
    %49 = arith.addf %47, %48 : vector<8x256xf32>
    %cst_33 = arith.constant 0.000000e+00 : f32
    %50 = vector.broadcast %cst_33 : f32 to vector<8x256xf32>
    %51 = arith.cmpf oge, %49, %50 : vector<8x256xf32>
    %cst_34 = arith.constant 0.00999999977 : f32
    %52 = vector.broadcast %cst_34 : f32 to vector<8x256xf32>
    %53 = arith.mulf %52, %49 : vector<8x256xf32>
    %54 = arith.select %51, %49, %53 : vector<8x256xi1>, vector<8x256xf32>
    %55 = arith.truncf %54 : vector<8x256xf32> to vector<8x256xbf16>
    %c0_35 = arith.constant 0 : index
    %c0_36 = arith.constant 0 : index
    %56 = vector.load %arg12[%c0_35, %c0_36] : memref<256x128xbf16, #tpu.memory_space<vmem>>, vector<256x128xbf16>
    %c0_37 = arith.constant 0 : index
    %c0_38 = arith.constant 0 : index
    %57 = vector.load %arg13[%c0_37, %c0_38] : memref<1x128xf32, #tpu.memory_space<vmem>>, vector<1x128xf32>
    %cst_39 = arith.constant dense<0.000000e+00> : vector<8x128xf32>
    %58 = tpu.matmul %55, %56, %cst_39 {dimension_numbers = #tpu.dot_dimension_numbers<[1], [0], [0], [1], [0, 0, 1, 1], [], []>} : vector<8x256xbf16>, vector<256x128xbf16>, vector<8x128xf32> -> vector<8x128xf32>
    %59 = vector.broadcast %57 : vector<1x128xf32> to vector<8x128xf32>
    %60 = arith.addf %58, %59 : vector<8x128xf32>
    %c0_40 = arith.constant 0 : index
    %c0_41 = arith.constant 0 : index
    %61 = vector.load %arg14[%c0_40, %c0_41] : memref<8x128xf32, #tpu.memory_space<vmem>>, vector<8x128xf32>
    tpu.vector_store %arg14[%c0_40, %c0_41], %60 {strides = array<i32>} : memref<8x128xf32, #tpu.memory_space<vmem>>, vector<8x128xf32>,
    return
  }
  func.func @transform_0(%arg0: i32) -> (i32, i32) {
    %c0_i32 = arith.constant 0 : i32
    %c0_i32_0 = arith.constant 0 : i32
    return %arg0, %c0_i32 : i32, i32
  }
  func.func @transform_1(%arg0: i32) -> (i32, i32) {
    %c0_i32 = arith.constant 0 : i32
    %c0_i32_0 = arith.constant 0 : i32
    %c0_i32_1 = arith.constant 0 : i32
    return %c0_i32, %c0_i32_0 : i32, i32
  }
  func.func @transform_2(%arg0: i32) -> (i32, i32) {
    %c0_i32 = arith.constant 0 : i32
    %c0_i32_0 = arith.constant 0 : i32
    %c0_i32_1 = arith.constant 0 : i32
    return %c0_i32, %c0_i32_0 : i32, i32
  }
  func.func @transform_3(%arg0: i32) -> (i32, i32) {
    %c0_i32 = arith.constant 0 : i32
    %c0_i32_0 = arith.constant 0 : i32
    %c0_i32_1 = arith.constant 0 : i32
    return %c0_i32, %c0_i32_0 : i32, i32
  }
  func.func @transform_4(%arg0: i32) -> (i32, i32) {
    %c0_i32 = arith.constant 0 : i32
    %c0_i32_0 = arith.constant 0 : i32
    %c0_i32_1 = arith.constant 0 : i32
    return %c0_i32, %c0_i32_0 : i32, i32
  }
  func.func @transform_5(%arg0: i32) -> (i32, i32) {
    %c0_i32 = arith.constant 0 : i32
    %c0_i32_0 = arith.constant 0 : i32
    %c0_i32_1 = arith.constant 0 : i32
    return %c0_i32, %c0_i32_0 : i32, i32
  }
  func.func @transform_6(%arg0: i32) -> (i32, i32) {
    %c0_i32 = arith.constant 0 : i32
    %c0_i32_0 = arith.constant 0 : i32
    %c0_i32_1 = arith.constant 0 : i32
    return %c0_i32, %c0_i32_0 : i32, i32
  }
  func.func @transform_7(%arg0: i32) -> (i32, i32) {
    %c0_i32 = arith.constant 0 : i32
    %c0_i32_0 = arith.constant 0 : i32
    %c0_i32_1 = arith.constant 0 : i32
    return %c0_i32, %c0_i32_0 : i32, i32
  }
  func.func @transform_8(%arg0: i32) -> (i32, i32) {
    %c0_i32 = arith.constant 0 : i32
    %c0_i32_0 = arith.constant 0 : i32
    %c0_i32_1 = arith.constant 0 : i32
    return %c0_i32, %c0_i32_0 : i32, i32
  }
  func.func @transform_9(%arg0: i32) -> (i32, i32) {
    %c0_i32 = arith.constant 0 : i32
    %c0_i32_0 = arith.constant 0 : i32
    %c0_i32_1 = arith.constant 0 : i32
    return %c0_i32, %c0_i32_0 : i32, i32
  }
  func.func @transform_10(%arg0: i32) -> (i32, i32) {
    %c0_i32 = arith.constant 0 : i32
    %c0_i32_0 = arith.constant 0 : i32
    %c0_i32_1 = arith.constant 0 : i32
    return %c0_i32, %c0_i32_0 : i32, i32
  }
  func.func @transform_11(%arg0: i32) -> (i32, i32) {
    %c0_i32 = arith.constant 0 : i32
    %c0_i32_0 = arith.constant 0 : i32
    %c0_i32_1 = arith.constant 0 : i32
    return %c0_i32, %c0_i32_0 : i32, i32
  }
  func.func @transform_12(%arg0: i32) -> (i32, i32) {
    %c0_i32 = arith.constant 0 : i32
    %c0_i32_0 = arith.constant 0 : i32
    %c0_i32_1 = arith.constant 0 : i32
    return %c0_i32, %c0_i32_0 : i32, i32
  }
  func.func @transform_13(%arg0: i32) -> (i32, i32) {
    %c0_i32 = arith.constant 0 : i32
    %c0_i32_0 = arith.constant 0 : i32
    return %arg0, %c0_i32 : i32, i32
  }
}

</mosaic_0001>

<bundles_post_ra>
// kernel: tpu_custom_call.1
= control target key start
LH: loop header
LB: loop body
LE: loop exit
PB: predicated region body
PF: predicated region fallthrough
CT: control target
= control target key end

     0   :  { %18 = vsyncpa [#allocation3], 0  ;;  %s2343_s0 = inlined_call_operand.hbm [shape: bf16[8,128], index: 0, kind: input, shape index: {}]   ;;  %s2344_s1 = inlined_call_operand.hbm [shape: bf16[128,256], index: 1, kind: input, shape index: {}]   ;;  %s2345_s2 = inlined_call_operand.vmem [shape: f32[1,256], index: 2, kind: input, shape index: {}]   ;;  %s2346_s3 = inlined_call_operand.hbm [shape: bf16[256,256], index: 3, kind: input, shape index: {}]   ;;  %s2347_s4 = inlined_call_operand.vmem [shape: f32[1,256], index: 4, kind: input, shape index: {}]   ;;  %s2348_s5 = inlined_call_operand.hbm [shape: bf16[256,256], index: 5, kind: input, shape index: {}]   ;;  %s2349_s6 = inlined_call_operand.vmem [shape: f32[1,256], index: 6, kind: input, shape index: {}]   ;;  %s2350_s7 = inlined_call_operand.hbm [shape: bf16[256,256], index: 7, kind: input, shape index: {}]   ;;  %s2351_s8 = inlined_call_operand.vmem [shape: f32[1,256], index: 8, kind: input, shape index: {}]   ;;  %s2352_s9 = inlined_call_operand.hbm [shape: bf16[256,256], index: 9, kind: input, shape index: {}]   ;;  %s2353_s10 = inlined_call_operand.vmem [shape: f32[1,256], index: 10, kind: input, shape index: {}]   ;;  %s2354_s11 = inlined_call_operand.hbm [shape: bf16[256,128], index: 11, kind: input, shape index: {}]   ;;  %s2355_s12 = inlined_call_operand.vmem [shape: f32[1,128], index: 12, kind: input, shape index: {}]   ;;  %s2356_s13 = inlined_call_operand.hbm [shape: f32[8,128], index: 13, kind: output, shape index: {}]  }
   0x1   :  { %19 = vsyncpa [#allocation6], 0 }
   0x2   :  { %20 = vsyncpa [#allocation9], 0 }
   0x3   :  { %21 = vsyncpa [#allocation12], 0 }
   0x4   :  { %22 = vsyncpa [#allocation4], 0  ;;  %s2117_s25 = smov [#allocation5]   ;;  %s1931_s29 = scalar_lea.hbm %s2344_s1, 2048 }
   0x5   :  { %s38_s26 = sshll.u32 %s2117_s25, 4  ;;  %p1932_p0 = scmp.ne.s32.totalorder %s2344_s1, %s1931_s29  ;;  %s39_s26 = int_to_ptr.vmem [resolvable:$true] %s38_s26 }
   0x6   :  { %p1935_p1 = scmp.lt.u32.totalorder %s1931_s29, %s2344_s1 }
   0x8   :  { %p1937_p2 = pnand %p1935_p1, %p1932_p0 }
   0xa   :  { %1940 = shalt.err (!%p1937_p2)
}
   0xb   :  { %s1941_s17 = scalar_lea.vmem %s39_s26, 2048  ;;  %p1946_p4 = scmp.lt.s32.totalorder %s39_s26, %s39_s26 }
   0xc   :  { %p1942_p3 = scmp.ne.s32.totalorder %s39_s26, %s1941_s17  ;;  %p1947_p5 = scmp.lt.s32.totalorder %s1941_s17, %s1941_s17 }
   0xe   :  { %p1948_p6 = por %p1947_p5, %p1946_p4 }
  0x10   :  { %p1949_p7 = pnand %p1948_p6, %p1942_p3 }
  0x12   :  { %1952 = shalt.err (!%p1949_p7)
}
  0x13   :  { %s2118_s18 = smov 128   ;;  %s2119_s19 = smov 8  }
  0x14   :  { %44 = dma.hbm_to_vmem [thread:$0]  %s2344_s1, 2048, %s39_s26, [#allocation6], %s2118_s18, %s2118_s18, %s2119_s19  }
  0x15   :  { %s2120_s22 = smov [#allocation8]   ;;  %s2121_s24 = smov [#allocation11]  }
  0x16   :  { %s66_s23 = sshll.u32 %s2120_s22, 4  ;;  %s94_s25 = sshll.u32 %s2121_s24, 4  ;;  %s67_s23 = int_to_ptr.vmem [resolvable:$true] %s66_s23  ;;  %s95_s25 = int_to_ptr.vmem [resolvable:$true] %s94_s25 }
  0x17   :  { %s1953_s29 = scalar_lea.hbm %s2348_s5, 4096 }
  0x18   :  { %p1954_p8 = scmp.ne.s32.totalorder %s2348_s5, %s1953_s29  ;;  %p1957_p9 = scmp.lt.u32.totalorder %s1953_s29, %s2348_s5 }
  0x1a   :  { %p1959_p10 = pnand %p1957_p9, %p1954_p8 }
  0x1c   :  { %1962 = shalt.err (!%p1959_p10)
}
  0x1d   :  { %s1963_s1 = scalar_lea.vmem %s67_s23, 4096  ;;  %p1968_p12 = scmp.lt.s32.totalorder %s67_s23, %s67_s23 }
  0x1e   :  { %p1964_p11 = scmp.ne.s32.totalorder %s67_s23, %s1963_s1  ;;  %p1969_p13 = scmp.lt.s32.totalorder %s1963_s1, %s1963_s1 }
  0x20   :  { %p1970_p0 = por %p1969_p13, %p1968_p12 }
  0x22   :  { %p1971_p1 = pnand %p1970_p0, %p1964_p11 }
  0x24   :  { %1974 = shalt.err (!%p1971_p1)
}
  0x25   :  { %72 = dma.hbm_to_vmem [thread:$0]  %s2348_s5, 4096, %s67_s23, [#allocation9], %s2118_s18, %s2118_s18, %s2119_s19  }
  0x26   :  { %s1975_s22 = scalar_lea.hbm %s2352_s9, 4096 }
  0x27   :  { %p1976_p2 = scmp.ne.s32.totalorder %s2352_s9, %s1975_s22  ;;  %p1979_p3 = scmp.lt.u32.totalorder %s1975_s22, %s2352_s9 }
  0x29   :  { %p1981_p4 = pnand %p1979_p3, %p1976_p2 }
  0x2b   :  { %1984 = shalt.err (!%p1981_p4)
}
  0x2c   :  { %s1985_s30 = scalar_lea.vmem %s95_s25, 4096  ;;  %p1990_p6 = scmp.lt.s32.totalorder %s95_s25, %s95_s25 }
  0x2d   :  { %p1986_p5 = scmp.ne.s32.totalorder %s95_s25, %s1985_s30  ;;  %p1991_p7 = scmp.lt.s32.totalorder %s1985_s30, %s1985_s30 }
  0x2f   :  { %p1992_p8 = por %p1991_p7, %p1990_p6 }
  0x31   :  { %p1993_p9 = pnand %p1992_p8, %p1986_p5 }
  0x33   :  { %1996 = shalt.err (!%p1993_p9)
}
  0x34   :  { %100 = dma.hbm_to_vmem [thread:$0]  %s2352_s9, 4096, %s95_s25, [#allocation12], %s2118_s18, %s2118_s18, %s2119_s19  }
  0x35   :  { %s2122_s14 = smov [#allocation2]   ;;  %s2123_s16 = smov [#allocation7]  }
  0x36   :  { %s29_s15 = sshll.u32 %s2122_s14, 4  ;;  %s52_s1 = sshll.u32 %s2123_s16, 4  ;;  %s30_s15 = int_to_ptr.vmem [resolvable:$true] %s29_s15  ;;  %s53_s1 = int_to_ptr.vmem [resolvable:$true] %s52_s1 }
  0x37   :  { %s1997_s20 = scalar_lea.hbm %s2343_s0, 64 }
  0x38   :  { %p1998_p10 = scmp.ne.s32.totalorder %s2343_s0, %s1997_s20  ;;  %p2001_p11 = scmp.lt.u32.totalorder %s1997_s20, %s2343_s0 }
  0x3a   :  { %p2003_p12 = pnand %p2001_p11, %p1998_p10 }
  0x3c   :  { %2006 = shalt.err (!%p2003_p12)
}
  0x3d   :  { %s2007_s9 = scalar_lea.vmem %s30_s15, 64  ;;  %p2012_p0 = scmp.lt.s32.totalorder %s30_s15, %s30_s15 }
  0x3e   :  { %p2008_p13 = scmp.ne.s32.totalorder %s30_s15, %s2007_s9  ;;  %p2013_p1 = scmp.lt.s32.totalorder %s2007_s9, %s2007_s9 }
  0x40   :  { %p2014_p2 = por %p2013_p1, %p2012_p0 }
  0x42   :  { %p2015_p3 = pnand %p2014_p2, %p2008_p13 }
  0x44   :  { %2018 = shalt.err (!%p2015_p3)
}
  0x45   :  { %32 = dma.hbm_to_vmem [thread:$0]  %s2343_s0, 64, %s30_s15, [#allocation3]  }
  0x46   :  { %s2019_s5 = scalar_lea.hbm %s2346_s3, 4096 }
  0x47   :  { %p2020_p4 = scmp.ne.s32.totalorder %s2346_s3, %s2019_s5  ;;  %p2023_p5 = scmp.lt.u32.totalorder %s2019_s5, %s2346_s3 }
  0x49   :  { %p2025_p6 = pnand %p2023_p5, %p2020_p4 }
  0x4b   :  { %2028 = shalt.err (!%p2025_p6)
}
  0x4c   :  { %s2029_s17 = scalar_lea.vmem %s53_s1, 4096  ;;  %p2034_p8 = scmp.lt.s32.totalorder %s53_s1, %s53_s1 }
  0x4d   :  { %p2030_p7 = scmp.ne.s32.totalorder %s53_s1, %s2029_s17  ;;  %p2035_p9 = scmp.lt.s32.totalorder %s2029_s17, %s2029_s17 }
  0x4f   :  { %p2036_p10 = por %p2035_p9, %p2034_p8 }
  0x51   :  { %p2037_p11 = pnand %p2036_p10, %p2030_p7 }
  0x53   :  { %2040 = shalt.err (!%p2037_p11)
}
  0x54   :  { %58 = dma.hbm_to_vmem [thread:$0]  %s2346_s3, 4096, %s53_s1, [#allocation6], %s2118_s18, %s2118_s18, %s2119_s19  }
  0x55   :  { %s2124_s20 = smov [#allocation10]   ;;  %s2125_s22 = smov [#allocation13]  }
  0x56   :  { %s80_s21 = sshll.u32 %s2124_s20, 4  ;;  %s108_s24 = sshll.u32 %s2125_s22, 4  ;;  %s81_s21 = int_to_ptr.vmem [resolvable:$true] %s80_s21  ;;  %s109_s24 = int_to_ptr.vmem [resolvable:$true] %s108_s24 }
  0x57   :  { %s2041_s25 = scalar_lea.hbm %s2350_s7, 4096 }
  0x58   :  { %p2042_p12 = scmp.ne.s32.totalorder %s2350_s7, %s2041_s25  ;;  %p2045_p13 = scmp.lt.u32.totalorder %s2041_s25, %s2350_s7 }
  0x5a   :  { %p2047_p0 = pnand %p2045_p13, %p2042_p12 }
  0x5c   :  { %2050 = shalt.err (!%p2047_p0)
}
  0x5d   :  { %s2051_s3 = scalar_lea.vmem %s81_s21, 4096  ;;  %p2056_p2 = scmp.lt.s32.totalorder %s81_s21, %s81_s21 }
  0x5e   :  { %p2052_p1 = scmp.ne.s32.totalorder %s81_s21, %s2051_s3  ;;  %p2057_p3 = scmp.lt.s32.totalorder %s2051_s3, %s2051_s3 }
  0x60   :  { %p2058_p4 = por %p2057_p3, %p2056_p2 }
  0x62   :  { %p2059_p5 = pnand %p2058_p4, %p2052_p1 }
  0x64   :  { %2062 = shalt.err (!%p2059_p5)
}
  0x65   :  { %86 = dma.hbm_to_vmem [thread:$0]  %s2350_s7, 4096, %s81_s21, [#allocation9], %s2118_s18, %s2118_s18, %s2119_s19  }
  0x66   :  { %s2063_s26 = scalar_lea.hbm %s2354_s11, 2048 }
  0x67   :  { %p2064_p6 = scmp.ne.s32.totalorder %s2354_s11, %s2063_s26  ;;  %p2067_p7 = scmp.lt.u32.totalorder %s2063_s26, %s2354_s11 }
  0x69   :  { %p2069_p8 = pnand %p2067_p7, %p2064_p6 }
  0x6b   :  { %2072 = shalt.err (!%p2069_p8)
}
  0x6c   :  { %s2073_s22 = scalar_lea.vmem %s109_s24, 2048  ;;  %p2078_p10 = scmp.lt.s32.totalorder %s109_s24, %s109_s24 }
  0x6d   :  { %p2074_p9 = scmp.ne.s32.totalorder %s109_s24, %s2073_s22  ;;  %p2079_p11 = scmp.lt.s32.totalorder %s2073_s22, %s2073_s22 }
  0x6f   :  { %p2080_p12 = por %p2079_p11, %p2078_p10 }
  0x71   :  { %p2081_p13 = pnand %p2080_p12, %p2074_p9 }
  0x73   :  { %2084 = shalt.err (!%p2081_p13)
}
  0x74   :  { %s2126_s7 = smov 64   ;;  %s2127_s18 = smov 4  }
  0x75   :  { %114 = dma.hbm_to_vmem [thread:$0]  %s2354_s11, 2048, %s109_s24, [#allocation12], %s2126_s7, %s2126_s7, %s2127_s18  }
  0x76   :  { %2107 = dma.done.wait [#allocation3], 64  }
  0x77   :  { %2108 = vsyncadd [#allocation3], 4294967232 }
  0x78   :  { %2109 = dma.done.wait [#allocation6], 6144  }
  0x79   :  { %2110 = vsyncadd [#allocation6], 4294961152 }
  0x7a   :  { %2111 = dma.done.wait [#allocation9], 8192  }
  0x7b   :  { %2112 = vsyncadd [#allocation9], 4294959104 }
  0x7c   :  { %2113 = dma.done.wait [#allocation12], 6144  }
  0x7d   :  { %2114 = vsyncadd [#allocation12], 4294961152  ;;  %v2128_v0 = vmov 0   ;;  %v1699_v1 = vld [vmem:[#allocation5 + $0x4] ss:$8 sps:$4 sm:$0xff]   ;;  %s2129_s30 = smov [#allocation14]  }
  0x7e   :  { %280 = vmatprep.mubr.bf16.mxu0 %v2128_v0  ;;  %v1701_v2 = vld [vmem:[#allocation5] ss:$8 sps:$4 sm:$0xff]   ;;  %248 = vmatprep.subr.bf16.mxu0 %v1699_v1  ;;  %v1702_v3 = vld [vmem:[#allocation5 + $0x14] ss:$8 sps:$4 sm:$0xff]   ;;  %v1704_v4 = vld [vmem:[#allocation5 + $0x10] ss:$8 sps:$4 sm:$0xff]  }
  0x7f   :  { %249 = vmatpush1.bf16.msra.mxu0 %v1701_v2  ;;  %v1705_v5 = vld [vmem:[#allocation5 + $0x24] ss:$8 sps:$4 sm:$0xff]   ;;  %v1707_v6 = vld [vmem:[#allocation5 + $0x20] ss:$8 sps:$4 sm:$0xff]   ;;  %v1708_v7 = vld [vmem:[#allocation5 + $0x34] ss:$8 sps:$4 sm:$0xff]  }
  0x80   :  { %250 = vmatprep.subr.bf16.mxu0 %v1702_v3  ;;  %v1710_v8 = vld [vmem:[#allocation5 + $0x30] ss:$8 sps:$4 sm:$0xff]   ;;  %v1711_v9 = vld [vmem:[#allocation5 + $0x44] ss:$8 sps:$4 sm:$0xff]   ;;  %v1725_v11 = vld [vmem:[#allocation7] ss:$8 sps:$4 sm:$0xff]  }
  0x81   :  { %v1723_v10 = vld [vmem:[#allocation7 + $0x4] ss:$8 sps:$4 sm:$0xff]   ;;  %v1726_v12 = vld [vmem:[#allocation7 + $0x14] ss:$8 sps:$4 sm:$0xff]   ;;  %v1713_v13 = vld [vmem:[#allocation5 + $0x40] ss:$8 sps:$4 sm:$0xff]  }
  0x82   :  { %501 = vmatprep.subr.bf16.mxu1 %v1723_v10  ;;  %v1728_v14 = vld [vmem:[#allocation7 + $0x10] ss:$8 sps:$4 sm:$0xff]   ;;  %v1729_v15 = vld [vmem:[#allocation7 + $0x24] ss:$8 sps:$4 sm:$0xff]   ;;  %v1714_v16 = vld [vmem:[#allocation5 + $0x54] ss:$8 sps:$4 sm:$0xff]  }
  0x83   :  { %251 = vmatpush1.bf16.msra.mxu0 %v1704_v4  ;;  %502 = vmatpush1.bf16.msra.mxu1 %v1725_v11  ;;  %v1716_v17 = vld [vmem:[#allocation5 + $0x50] ss:$8 sps:$4 sm:$0xff]   ;;  %v1731_v18 = vld [vmem:[#allocation7 + $0x20] ss:$8 sps:$4 sm:$0xff]   ;;  %v1732_v19 = vld [vmem:[#allocation7 + $0x34] ss:$8 sps:$4 sm:$0xff]  }
  0x84   :  { %252 = vmatprep.subr.bf16.mxu0 %v1705_v5  ;;  %503 = vmatprep.subr.bf16.mxu1 %v1726_v12  ;;  %v1717_v20 = vld [vmem:[#allocation5 + $0x64] ss:$8 sps:$4 sm:$0xff]   ;;  %v1719_v21 = vld [vmem:[#allocation5 + $0x60] ss:$8 sps:$4 sm:$0xff]   ;;  %v1734_v22 = vld [vmem:[#allocation7 + $0x30] ss:$8 sps:$4 sm:$0xff]  }
  0x85   :  { %v1735_v23 = vld [vmem:[#allocation7 + $0x44] ss:$8 sps:$4 sm:$0xff]   ;;  %v1720_v24 = vld [vmem:[#allocation5 + $0x74] ss:$8 sps:$4 sm:$0xff]   ;;  %v1722_v25 = vld [vmem:[#allocation5 + $0x70] ss:$8 sps:$4 sm:$0xff]  }
  0x86   :  { %v1737_v26 = vld [vmem:[#allocation7 + $0x40] ss:$8 sps:$4 sm:$0xff]   ;;  %v1738_v27 = vld [vmem:[#allocation7 + $0x54] ss:$8 sps:$4 sm:$0xff]   ;;  %v1740_v29 = vld [vmem:[#allocation7 + $0x50] ss:$8 sps:$4 sm:$0xff]  }
  0x87   :  { %253 = vmatpush1.bf16.msra.mxu0 %v1707_v6  ;;  %504 = vmatpush1.bf16.msra.mxu1 %v1728_v14  ;;  %v139_v28 = vld [vmem:[#allocation2] sm:$0xf]  ;;  %v1741_v30 = vld [vmem:[#allocation7 + $0x64] ss:$8 sps:$4 sm:$0xff]   ;;  %v1743_v31 = vld [vmem:[#allocation7 + $0x60] ss:$8 sps:$4 sm:$0xff]   ;;  %v158_v14 = vlaneseq }
  0x88   :  { %254 = vmatprep.subr.bf16.mxu0 %v1708_v7  ;;  %505 = vmatprep.subr.bf16.mxu1 %v1729_v15  ;;  %v1744_v32 = vld [vmem:[#allocation7 + $0x74] ss:$8 sps:$4 sm:$0xff]   ;;  %v1746_v33 = vld [vmem:[#allocation7 + $0x70] ss:$8 sps:$4 sm:$0xff]   ;;  %v1747_v34 = vld [vmem:[#allocation7 + $0x84] ss:$8 sps:$4 sm:$0xff]  }
  0x89   :  { %v1749_v35 = vld [vmem:[#allocation7 + $0x80] ss:$8 sps:$4 sm:$0xff]   ;;  %v1750_v36 = vld [vmem:[#allocation7 + $0x94] ss:$8 sps:$4 sm:$0xff]   ;;  %v1752_v37 = vld [vmem:[#allocation7 + $0x90] ss:$8 sps:$4 sm:$0xff]  }
  0x8a   :  { %v1753_v38 = vld [vmem:[#allocation7 + $0xa4] ss:$8 sps:$4 sm:$0xff]   ;;  %v1755_v39 = vld [vmem:[#allocation7 + $0xa0] ss:$8 sps:$4 sm:$0xff]   ;;  %v1756_v40 = vld [vmem:[#allocation7 + $0xb4] ss:$8 sps:$4 sm:$0xff]  }
  0x8b   :  { %255 = vmatpush1.bf16.msra.mxu0 %v1710_v8  ;;  %506 = vmatpush1.bf16.msra.mxu1 %v1731_v18  ;;  %v1758_v41 = vld [vmem:[#allocation7 + $0xb0] ss:$8 sps:$4 sm:$0xff]   ;;  %v1759_v42 = vld [vmem:[#allocation7 + $0xc4] ss:$8 sps:$4 sm:$0xff]   ;;  %v1761_v43 = vld [vmem:[#allocation7 + $0xc0] ss:$8 sps:$4 sm:$0xff]  }
  0x8c   :  { %256 = vmatprep.subr.bf16.mxu0 %v1711_v9  ;;  %507 = vmatprep.subr.bf16.mxu1 %v1732_v19  ;;  %v1762_v44 = vld [vmem:[#allocation7 + $0xd4] ss:$8 sps:$4 sm:$0xff]   ;;  %v1764_v45 = vld [vmem:[#allocation7 + $0xd0] ss:$8 sps:$4 sm:$0xff]   ;;  %v1765_v46 = vld [vmem:[#allocation7 + $0xe4] ss:$8 sps:$4 sm:$0xff]  }
  0x8d   :  { %v1767_v47 = vld [vmem:[#allocation7 + $0xe0] ss:$8 sps:$4 sm:$0xff]   ;;  %v1768_v48 = vld [vmem:[#allocation7 + $0xf4] ss:$8 sps:$4 sm:$0xff]   ;;  %v1770_v49 = vld [vmem:[#allocation7 + $0xf0] ss:$8 sps:$4 sm:$0xff]  }
  0x8e   :  { %v1771_v50 = vld [vmem:[#allocation8] ss:$8 sps:$4 sm:$0xff]   ;;  %v1773_v51 = vld [vmem:[#allocation8 + $0x4] ss:$8 sps:$4 sm:$0xff]   ;;  %v1776_v52 = vld [vmem:[#allocation8 + $0x14] ss:$8 sps:$4 sm:$0xff]  }
  0x8f   :  { %257 = vmatpush1.bf16.msra.mxu0 %v1713_v13  ;;  %508 = vmatpush1.bf16.msra.mxu1 %v1734_v22  ;;  %v1774_v53 = vld [vmem:[#allocation8 + $0x10] ss:$8 sps:$4 sm:$0xff]   ;;  %v1779_v54 = vld [vmem:[#allocation8 + $0x24] ss:$8 sps:$4 sm:$0xff]   ;;  %v1777_v55 = vld [vmem:[#allocation8 + $0x20] ss:$8 sps:$4 sm:$0xff]  }
  0x90   :  { %258 = vmatprep.subr.bf16.mxu0 %v1714_v16  ;;  %509 = vmatprep.subr.bf16.mxu1 %v1735_v23  ;;  %v1782_v56 = vld [vmem:[#allocation8 + $0x34] ss:$8 sps:$4 sm:$0xff]   ;;  %v1780_v57 = vld [vmem:[#allocation8 + $0x30] ss:$8 sps:$4 sm:$0xff]   ;;  %v1785_v58 = vld [vmem:[#allocation8 + $0x44] ss:$8 sps:$4 sm:$0xff]  }
  0x91   :  { %v1783_v59 = vld [vmem:[#allocation8 + $0x40] ss:$8 sps:$4 sm:$0xff]   ;;  %v1788_v60 = vld [vmem:[#allocation8 + $0x54] ss:$8 sps:$4 sm:$0xff]   ;;  %v1786_v61 = vld [vmem:[#allocation8 + $0x50] ss:$8 sps:$4 sm:$0xff]  }
  0x92   :  { %v1791_v62 = vld [vmem:[#allocation8 + $0x64] ss:$8 sps:$4 sm:$0xff]   ;;  %v1789_v63 = vld [vmem:[#allocation8 + $0x60] ss:$8 sps:$4 sm:$0xff]   ;;  %v1794_v0 = vld [vmem:[#allocation8 + $0x74] ss:$8 sps:$4 sm:$0xff]  }
  0x93   :  { %259 = vmatpush1.bf16.msra.mxu0 %v1716_v17  ;;  %510 = vmatpush1.bf16.msra.mxu1 %v1737_v26  ;;  %v1792_v1 = vld [vmem:[#allocation8 + $0x70] ss:$8 sps:$4 sm:$0xff]   ;;  %v1797_v2 = vld [vmem:[#allocation8 + $0x84] ss:$8 sps:$4 sm:$0xff]   ;;  %v1795_v3 = vld [vmem:[#allocation8 + $0x80] ss:$8 sps:$4 sm:$0xff]  }
  0x94   :  { %260 = vmatprep.subr.bf16.mxu0 %v1717_v20  ;;  %511 = vmatprep.subr.bf16.mxu1 %v1738_v27  ;;  %v1800_v4 = vld [vmem:[#allocation8 + $0x94] ss:$8 sps:$4 sm:$0xff]   ;;  %v1798_v5 = vld [vmem:[#allocation8 + $0x90] ss:$8 sps:$4 sm:$0xff]   ;;  %v1803_v6 = vld [vmem:[#allocation8 + $0xa4] ss:$8 sps:$4 sm:$0xff]  }
  0x95   :  { %v1801_v7 = vld [vmem:[#allocation8 + $0xa0] ss:$8 sps:$4 sm:$0xff]   ;;  %v1806_v8 = vld [vmem:[#allocation8 + $0xb4] ss:$8 sps:$4 sm:$0xff]   ;;  %v1804_v9 = vld [vmem:[#allocation8 + $0xb0] ss:$8 sps:$4 sm:$0xff]  }
  0x96   :  { %v1809_v10 = vld [vmem:[#allocation8 + $0xc4] ss:$8 sps:$4 sm:$0xff]   ;;  %v1807_v11 = vld [vmem:[#allocation8 + $0xc0] ss:$8 sps:$4 sm:$0xff]   ;;  %v1812_v12 = vld [vmem:[#allocation8 + $0xd4] ss:$8 sps:$4 sm:$0xff]  }
  0x97   :  { %261 = vmatpush1.bf16.msra.mxu0 %v1719_v21  ;;  %512 = vmatpush1.bf16.msra.mxu1 %v1740_v29  ;;  %v1810_v13 = vld [vmem:[#allocation8 + $0xd0] ss:$8 sps:$4 sm:$0xff]   ;;  %v159_v15 = vshrl.u32 %v158_v14, 7  ;;  %v156_v17 = vld [vmem:[%s2345_s2] sm:$0x3]  ;;  %s1491_s5 = sshll.u32 %s2129_s30, 4  ;;  %s1492_s5 = int_to_ptr.vmem [resolvable:$true] %s1491_s5 }
  0x98   :  { %262 = vmatprep.subr.bf16.mxu0 %v1720_v24  ;;  %513 = vmatprep.subr.bf16.mxu1 %v1741_v30  ;;  %s2085_s3 = scalar_lea.vmem %s1492_s5, 128  ;;  %p2090_p1 = scmp.lt.s32.totalorder %s1492_s5, %s1492_s5 }
  0x99   :  { %v2299_v16 = vsub.s32 0, %v159_v15  ;;  %v2304_v18 = vsub.s32 1, %v159_v15  ;;  %p2086_p0 = scmp.ne.s32.totalorder %s1492_s5, %s2085_s3  ;;  %p2091_p2 = scmp.lt.s32.totalorder %s2085_s3, %s2085_s3 }
  0x9b   :  { %263 = vmatpush1.bf16.msra.mxu0 %v1722_v25  ;;  %514 = vmatpush1.bf16.msra.mxu1 %v1743_v31  ;;  %v161_v19 = vrot.slane %v156_v17, %v2299_v16  ;;  %v165_v20 = vrot.slane %v156_v17, %v2304_v18  ;;  %v1863_v17 = vld [vmem:[#allocation10 + $0xe4] ss:$8 sps:$4 sm:$0xff]   ;;  %p2092_p3 = por %p2091_p2, %p2090_p1 }
  0x9c   :  { %515 = vmatprep.subr.bf16.mxu1 %v1744_v32  ;;  %754 = vmatprep.subr.bf16.mxu0 %v1773_v51  ;;  %v1842_v51 = vld [vmem:[#allocation10 + $0x74] ss:$8 sps:$4 sm:$0xff]  }
  0x9d   :  { %p2093_p4 = pnand %p2092_p3, %p2086_p0 }
  0x9e   :  { %281 = vmatmul.mubr.bf16.vlgmr.msra.gmra.mrb[0].mxu0 %v139_v28 }
  0x9f   :  { %516 = vmatpush1.bf16.msra.mxu1 %v1746_v33  ;;  %755 = vmatpush1.bf16.msra.mxu0 %v1771_v50  ;;  %v1815_v33 = vld [vmem:[#allocation8 + $0xe4] ss:$8 sps:$4 sm:$0xff]   ;;  %v1837_v50 = vld [vmem:[#allocation10 + $0x60] ss:$8 sps:$4 sm:$0xff]  }
  0xa0   :  { %517 = vmatprep.subr.bf16.mxu1 %v1747_v34  ;;  %756 = vmatprep.subr.bf16.mxu0 %v1776_v52  ;;  %v1813_v34 = vld [vmem:[#allocation8 + $0xe0] ss:$8 sps:$4 sm:$0xff]   ;;  %v1840_v52 = vld [vmem:[#allocation10 + $0x70] ss:$8 sps:$4 sm:$0xff]  }
  0xa3   :  { %518 = vmatpush1.bf16.msra.mxu1 %v1749_v35  ;;  %757 = vmatpush1.bf16.msra.mxu0 %v1774_v53  ;;  %v1818_v35 = vld [vmem:[#allocation8 + $0xf4] ss:$8 sps:$4 sm:$0xff]   ;;  %v1845_v53 = vld [vmem:[#allocation10 + $0x84] ss:$8 sps:$4 sm:$0xff]  }
  0xa4   :  { %519 = vmatprep.subr.bf16.mxu1 %v1750_v36  ;;  %758 = vmatprep.subr.bf16.mxu0 %v1779_v54  ;;  %v1816_v36 = vld [vmem:[#allocation8 + $0xf0] ss:$8 sps:$4 sm:$0xff]   ;;  %v1843_v54 = vld [vmem:[#allocation10 + $0x80] ss:$8 sps:$4 sm:$0xff]  }
  0xa7   :  { %520 = vmatpush1.bf16.msra.mxu1 %v1752_v37  ;;  %759 = vmatpush1.bf16.msra.mxu0 %v1777_v55  ;;  %v1819_v37 = vld [vmem:[#allocation10] ss:$8 sps:$4 sm:$0xff]   ;;  %v1848_v55 = vld [vmem:[#allocation10 + $0x94] ss:$8 sps:$4 sm:$0xff]  }
  0xa8   :  { %521 = vmatprep.subr.bf16.mxu1 %v1753_v38  ;;  %760 = vmatprep.subr.bf16.mxu0 %v1782_v56  ;;  %v1821_v38 = vld [vmem:[#allocation10 + $0x4] ss:$8 sps:$4 sm:$0xff]   ;;  %v1846_v56 = vld [vmem:[#allocation10 + $0x90] ss:$8 sps:$4 sm:$0xff]  }
  0xab   :  { %522 = vmatpush1.bf16.msra.mxu1 %v1755_v39  ;;  %761 = vmatpush1.bf16.msra.mxu0 %v1780_v57  ;;  %v1824_v39 = vld [vmem:[#allocation10 + $0x14] ss:$8 sps:$4 sm:$0xff]   ;;  %v1851_v57 = vld [vmem:[#allocation10 + $0xa4] ss:$8 sps:$4 sm:$0xff]  }
  0xac   :  { %523 = vmatprep.subr.bf16.mxu1 %v1756_v40  ;;  %762 = vmatprep.subr.bf16.mxu0 %v1785_v58  ;;  %v1822_v40 = vld [vmem:[#allocation10 + $0x10] ss:$8 sps:$4 sm:$0xff]   ;;  %v1849_v58 = vld [vmem:[#allocation10 + $0xa0] ss:$8 sps:$4 sm:$0xff]  }
  0xaf   :  { %524 = vmatpush1.bf16.msra.mxu1 %v1758_v41  ;;  %763 = vmatpush1.bf16.msra.mxu0 %v1783_v59  ;;  %v1827_v41 = vld [vmem:[#allocation10 + $0x24] ss:$8 sps:$4 sm:$0xff]   ;;  %v1854_v59 = vld [vmem:[#allocation10 + $0xb4] ss:$8 sps:$4 sm:$0xff]  }
  0xb0   :  { %525 = vmatprep.subr.bf16.mxu1 %v1759_v42  ;;  %764 = vmatprep.subr.bf16.mxu0 %v1788_v60  ;;  %v1825_v42 = vld [vmem:[#allocation10 + $0x20] ss:$8 sps:$4 sm:$0xff]   ;;  %v1852_v60 = vld [vmem:[#allocation10 + $0xb0] ss:$8 sps:$4 sm:$0xff]  }
  0xb3   :  { %526 = vmatpush1.bf16.msra.mxu1 %v1761_v43  ;;  %765 = vmatpush1.bf16.msra.mxu0 %v1786_v61  ;;  %v1830_v43 = vld [vmem:[#allocation10 + $0x34] ss:$8 sps:$4 sm:$0xff]   ;;  %v1857_v61 = vld [vmem:[#allocation10 + $0xc4] ss:$8 sps:$4 sm:$0xff]  }
  0xb4   :  { %527 = vmatprep.subr.bf16.mxu1 %v1762_v44  ;;  %766 = vmatprep.subr.bf16.mxu0 %v1791_v62  ;;  %v1828_v44 = vld [vmem:[#allocation10 + $0x30] ss:$8 sps:$4 sm:$0xff]   ;;  %v1855_v62 = vld [vmem:[#allocation10 + $0xc0] ss:$8 sps:$4 sm:$0xff]  }
  0xb7   :  { %528 = vmatpush1.bf16.msra.mxu1 %v1764_v45  ;;  %767 = vmatpush1.bf16.msra.mxu0 %v1789_v63  ;;  %v1833_v45 = vld [vmem:[#allocation10 + $0x44] ss:$8 sps:$4 sm:$0xff]   ;;  %v1860_v63 = vld [vmem:[#allocation10 + $0xd4] ss:$8 sps:$4 sm:$0xff]  }
  0xb8   :  { %529 = vmatprep.subr.bf16.mxu1 %v1765_v46  ;;  %768 = vmatprep.subr.bf16.mxu0 %v1794_v0  ;;  %v1831_v46 = vld [vmem:[#allocation10 + $0x40] ss:$8 sps:$4 sm:$0xff]   ;;  %v1858_v0 = vld [vmem:[#allocation10 + $0xd0] ss:$8 sps:$4 sm:$0xff]  }
  0xbb   :  { %530 = vmatpush1.bf16.msra.mxu1 %v1767_v47  ;;  %769 = vmatpush1.bf16.msra.mxu0 %v1792_v1  ;;  %v1836_v47 = vld [vmem:[#allocation10 + $0x54] ss:$8 sps:$4 sm:$0xff]  }
  0xbc   :  { %531 = vmatprep.subr.bf16.mxu1 %v1768_v48  ;;  %770 = vmatprep.subr.bf16.mxu0 %v1797_v2  ;;  %v1834_v48 = vld [vmem:[#allocation10 + $0x50] ss:$8 sps:$4 sm:$0xff]   ;;  %v329_v1 = vld [vmem:[%s2347_s4] sm:$0x3] }
  0xbd   :  { %v334_v2 = vrot.slane %v329_v1, %v2299_v16 }
  0xbf   :  { %532 = vmatpush1.bf16.msra.mxu1 %v1770_v49  ;;  %771 = vmatpush1.bf16.msra.mxu0 %v1795_v3  ;;  %v1839_v49 = vld [vmem:[#allocation10 + $0x64] ss:$8 sps:$4 sm:$0xff]   ;;  %v338_v3 = vrot.slane %v329_v1, %v2304_v18 }
  0xc0   :  { %772 = vmatprep.subr.bf16.mxu0 %v1800_v4  ;;  %1007 = vmatprep.subr.bf16.mxu1 %v1821_v38  ;;  %v1893_v38 = vld [vmem:[#allocation11 + $0x84] ss:$8 sps:$4 sm:$0xff]  }
  0xc1   :  { %v1911_v1 = vld [vmem:[#allocation11 + $0xe4] ss:$8 sps:$4 sm:$0xff]  }
  0xc3   :  { %773 = vmatpush1.bf16.msra.mxu0 %v1798_v5 }
  0xc4   :  { %774 = vmatprep.subr.bf16.mxu0 %v1803_v6 }
  0xc7   :  { %775 = vmatpush1.bf16.msra.mxu0 %v1801_v7 }
  0xc8   :  { %776 = vmatprep.subr.bf16.mxu0 %v1806_v8 }
  0xcb   :  { %777 = vmatpush1.bf16.msra.mxu0 %v1804_v9 }
  0xcc   :  { %778 = vmatprep.subr.bf16.mxu0 %v1809_v10 }
  0xcf   :  { %779 = vmatpush1.bf16.msra.mxu0 %v1807_v11 }
  0xd0   :  { %780 = vmatprep.subr.bf16.mxu0 %v1812_v12 }
  0xd3   :  { %781 = vmatpush1.bf16.msra.mxu0 %v1810_v13 }
  0xd4   :  { %782 = vmatprep.subr.bf16.mxu0 %v1815_v33  ;;  %v1882_v33 = vld [vmem:[#allocation11 + $0x50] ss:$8 sps:$4 sm:$0xff]  }
  0xd7   :  { %783 = vmatpush1.bf16.msra.mxu0 %v1813_v34  ;;  %v1887_v34 = vld [vmem:[#allocation11 + $0x64] ss:$8 sps:$4 sm:$0xff]  }
  0xd8   :  { %784 = vmatprep.subr.bf16.mxu0 %v1818_v35  ;;  %v1885_v35 = vld [vmem:[#allocation11 + $0x60] ss:$8 sps:$4 sm:$0xff]  }
  0xdb   :  { %785 = vmatpush1.bf16.msra.mxu0 %v1816_v36  ;;  %v1890_v36 = vld [vmem:[#allocation11 + $0x74] ss:$8 sps:$4 sm:$0xff]  }
 0x171   :  { %v282_v21 = vpop.f32.mrb[0].mxu0 }
 0x172   :  { %v283_v22 = vadd.f32 %v282_v21, %v161_v19  ;;  %v284_v23 = vpop.f32.mrb[1].mxu0  ;;  %v1861_v19 = vld [vmem:[#allocation10 + $0xe0] ss:$8 sps:$4 sm:$0xff]   ;;  %v1864_v21 = vld [vmem:[#allocation10 + $0xf0] ss:$8 sps:$4 sm:$0xff]  }
 0x173   :  { %v285_v24 = vadd.f32 %v284_v23, %v165_v20  ;;  %v286_v25 = vpop.f32.mrb[2].mxu0  ;;  %v1866_v20 = vld [vmem:[#allocation10 + $0xf4] ss:$8 sps:$4 sm:$0xff]   ;;  %v1869_v23 = vld [vmem:[#allocation11 + $0x4] ss:$8 sps:$4 sm:$0xff]  }
 0x174   :  { %vm289_vm0 = vcmp.ge.f32.partialorder %v283_v22, 0.0  ;;  %v291_v26 = vmul.f32 0.01, %v283_v22  ;;  %v287_v27 = vpop.f32.mrb[3].mxu0  ;;  %1260 = vmatprep.subr.bf16.mxu0 %v1869_v23  ;;  %v1870_v25 = vld [vmem:[#allocation11 + $0x10] ss:$8 sps:$4 sm:$0xff]  }
 0x175   :  { %vm290_vm1 = vcmp.ge.f32.partialorder %v285_v24, 0.0  ;;  %v292_v28 = vmul.f32 0.01, %v285_v24  ;;  %v1873_v27 = vld [vmem:[#allocation11 + $0x20] ss:$8 sps:$4 sm:$0xff]  }
 0x176   :  { %v293_v29 = vsel %vm289_vm0, %v283_v22, %v291_v26  ;;  %v1867_v22 = vld [vmem:[#allocation11] ss:$8 sps:$4 sm:$0xff]   ;;  %v1875_v26 = vld [vmem:[#allocation11 + $0x24] ss:$8 sps:$4 sm:$0xff]  }
 0x177   :  { %v294_v30 = vsel %vm290_vm1, %v285_v24, %v292_v28  ;;  %v295_v32 = vpack.c.bf16 %v293_v29, %v293_v29  ;;  %v1872_v24 = vld [vmem:[#allocation11 + $0x14] ss:$8 sps:$4 sm:$0xff]   ;;  %v1876_v29 = vld [vmem:[#allocation11 + $0x30] ss:$8 sps:$4 sm:$0xff]  }
 0x178   :  { %v296_v31 = vpack.c.bf16 %v294_v30, %v294_v30  ;;  %v1878_v28 = vld [vmem:[#allocation11 + $0x34] ss:$8 sps:$4 sm:$0xff]   ;;  %v1881_v30 = vld [vmem:[#allocation11 + $0x44] ss:$8 sps:$4 sm:$0xff]  }
 0x17a   :  { %533 = vmatprep.mubr.bf16.mxu1 %v296_v31  ;;  %v1879_v31 = vld [vmem:[#allocation11 + $0x40] ss:$8 sps:$4 sm:$0xff]  }
 0x17b   :  { %534 = vmatmul.mubr.bf16.vlgmr.msra.gmra.mrb[0].mxu1 %v295_v32  ;;  %v1884_v32 = vld [vmem:[#allocation11 + $0x54] ss:$8 sps:$4 sm:$0xff]  }
 0x17c   :  { %1008 = vmatpush1.bf16.msra.mxu1 %v1819_v37  ;;  %v1888_v37 = vld [vmem:[#allocation11 + $0x70] ss:$8 sps:$4 sm:$0xff]  }
 0x17d   :  { %1009 = vmatprep.subr.bf16.mxu1 %v1824_v39  ;;  %v1891_v39 = vld [vmem:[#allocation11 + $0x80] ss:$8 sps:$4 sm:$0xff]  }
 0x180   :  { %1010 = vmatpush1.bf16.msra.mxu1 %v1822_v40  ;;  %v1896_v40 = vld [vmem:[#allocation11 + $0x94] ss:$8 sps:$4 sm:$0xff]  }
 0x181   :  { %1011 = vmatprep.subr.bf16.mxu1 %v1827_v41  ;;  %v1894_v41 = vld [vmem:[#allocation11 + $0x90] ss:$8 sps:$4 sm:$0xff]  }
 0x184   :  { %1012 = vmatpush1.bf16.msra.mxu1 %v1825_v42  ;;  %v1899_v42 = vld [vmem:[#allocation11 + $0xa4] ss:$8 sps:$4 sm:$0xff]  }
 0x185   :  { %1013 = vmatprep.subr.bf16.mxu1 %v1830_v43  ;;  %v1897_v43 = vld [vmem:[#allocation11 + $0xa0] ss:$8 sps:$4 sm:$0xff]  }
 0x188   :  { %1014 = vmatpush1.bf16.msra.mxu1 %v1828_v44  ;;  %v1902_v44 = vld [vmem:[#allocation11 + $0xb4] ss:$8 sps:$4 sm:$0xff]  }
 0x189   :  { %1015 = vmatprep.subr.bf16.mxu1 %v1833_v45  ;;  %v1900_v45 = vld [vmem:[#allocation11 + $0xb0] ss:$8 sps:$4 sm:$0xff]  }
 0x18c   :  { %1016 = vmatpush1.bf16.msra.mxu1 %v1831_v46  ;;  %v1905_v46 = vld [vmem:[#allocation11 + $0xc4] ss:$8 sps:$4 sm:$0xff]  }
 0x18d   :  { %1017 = vmatprep.subr.bf16.mxu1 %v1836_v47  ;;  %v1903_v47 = vld [vmem:[#allocation11 + $0xc0] ss:$8 sps:$4 sm:$0xff]  }
 0x190   :  { %1018 = vmatpush1.bf16.msra.mxu1 %v1834_v48  ;;  %v1908_v48 = vld [vmem:[#allocation11 + $0xd4] ss:$8 sps:$4 sm:$0xff]  }
 0x191   :  { %1019 = vmatprep.subr.bf16.mxu1 %v1839_v49  ;;  %v1906_v49 = vld [vmem:[#allocation11 + $0xd0] ss:$8 sps:$4 sm:$0xff]  }
 0x194   :  { %1020 = vmatpush1.bf16.msra.mxu1 %v1837_v50  ;;  %v582_v50 = vld [vmem:[%s2349_s6] sm:$0x3] }
 0x195   :  { %1021 = vmatprep.subr.bf16.mxu1 %v1842_v51  ;;  %v587_v51 = vrot.slane %v582_v50, %v2299_v16 }
 0x198   :  { %1022 = vmatpush1.bf16.msra.mxu1 %v1840_v52  ;;  %v591_v52 = vrot.slane %v582_v50, %v2304_v18 }
 0x199   :  { %1023 = vmatprep.subr.bf16.mxu1 %v1845_v53 }
 0x19c   :  { %1024 = vmatpush1.bf16.msra.mxu1 %v1843_v54 }
 0x19d   :  { %1025 = vmatprep.subr.bf16.mxu1 %v1848_v55 }
 0x1a0   :  { %1026 = vmatpush1.bf16.msra.mxu1 %v1846_v56 }
 0x1a1   :  { %1027 = vmatprep.subr.bf16.mxu1 %v1851_v57 }
 0x1a4   :  { %1028 = vmatpush1.bf16.msra.mxu1 %v1849_v58 }
 0x1a5   :  { %1029 = vmatprep.subr.bf16.mxu1 %v1854_v59 }
 0x1a8   :  { %1030 = vmatpush1.bf16.msra.mxu1 %v1852_v60 }
 0x1a9   :  { %1031 = vmatprep.subr.bf16.mxu1 %v1857_v61 }
 0x1ac   :  { %1032 = vmatpush1.bf16.msra.mxu1 %v1855_v62 }
 0x1ad   :  { %1033 = vmatprep.subr.bf16.mxu1 %v1860_v63 }
 0x1b0   :  { %1034 = vmatpush1.bf16.msra.mxu1 %v1858_v0 }
 0x1b1   :  { %1035 = vmatprep.subr.bf16.mxu1 %v1863_v17  ;;  %v1926_v17 = vld [vmem:[#allocation13 + $0x28] sm:$0xff]  }
 0x1b4   :  { %1036 = vmatpush1.bf16.msra.mxu1 %v1861_v19  ;;  %v835_v19 = vld [vmem:[%s2351_s8] sm:$0x3] }
 0x1b5   :  { %1037 = vmatprep.subr.bf16.mxu1 %v1866_v20  ;;  %v840_v20 = vrot.slane %v835_v19, %v2299_v16 }
 0x1b8   :  { %1038 = vmatpush1.bf16.msra.mxu1 %v1864_v21  ;;  %v844_v21 = vrot.slane %v835_v19, %v2304_v18 }
 0x24e   :  { %v535_v4 = vpop.f32.mrb[0].mxu1 }
 0x24f   :  { %v536_v5 = vadd.f32 %v535_v4, %v334_v2  ;;  %v537_v6 = vpop.f32.mrb[1].mxu1  ;;  %v1909_v2 = vld [vmem:[#allocation11 + $0xe0] ss:$8 sps:$4 sm:$0xff]   ;;  %v1912_v4 = vld [vmem:[#allocation11 + $0xf0] ss:$8 sps:$4 sm:$0xff]  }
 0x250   :  { %v538_v7 = vadd.f32 %v537_v6, %v338_v3  ;;  %v539_v8 = vpop.f32.mrb[2].mxu1  ;;  %v1914_v3 = vld [vmem:[#allocation11 + $0xf4] ss:$8 sps:$4 sm:$0xff]   ;;  %v1916_v6 = vld [vmem:[#allocation13] sm:$0xff]  }
 0x251   :  { %vm542_vm2 = vcmp.ge.f32.partialorder %v536_v5, 0.0  ;;  %v544_v9 = vmul.f32 0.01, %v536_v5  ;;  %v540_v10 = vpop.f32.mrb[3].mxu1  ;;  %v1918_v8 = vld [vmem:[#allocation13 + $0x8] sm:$0xff]  }
 0x252   :  { %vm543_vm3 = vcmp.ge.f32.partialorder %v538_v7, 0.0  ;;  %v545_v11 = vmul.f32 0.01, %v538_v7  ;;  %v1920_v10 = vld [vmem:[#allocation13 + $0x10] sm:$0xff]  }
 0x253   :  { %v546_v12 = vsel %vm542_vm2, %v536_v5, %v544_v9  ;;  %v1915_v5 = vld [vmem:[#allocation13 + $0x40] sm:$0xff]   ;;  %v1919_v9 = vld [vmem:[#allocation13 + $0x50] sm:$0xff]  }
 0x254   :  { %v547_v13 = vsel %vm543_vm3, %v538_v7, %v545_v11  ;;  %v548_v15 = vpack.c.bf16 %v546_v12, %v546_v12  ;;  %v1917_v7 = vld [vmem:[#allocation13 + $0x48] sm:$0xff]   ;;  %1664 = vmatprep.subr.bf16.mxu1 %v1915_v5  ;;  %v1921_v11 = vld [vmem:[#allocation13 + $0x58] sm:$0xff]  }
 0x255   :  { %v549_v14 = vpack.c.bf16 %v547_v13, %v547_v13  ;;  %v1922_v12 = vld [vmem:[#allocation13 + $0x18] sm:$0xff]   ;;  %v1923_v13 = vld [vmem:[#allocation13 + $0x60] sm:$0xff]  }
 0x257   :  { %786 = vmatprep.mubr.bf16.mxu0 %v549_v14  ;;  %v1924_v14 = vld [vmem:[#allocation13 + $0x20] sm:$0xff]  }
 0x258   :  { %787 = vmatmul.mubr.bf16.vlgmr.msra.gmra.mrb[4].mxu0 %v548_v15  ;;  %v1925_v15 = vld [vmem:[#allocation13 + $0x68] sm:$0xff]  }
 0x259   :  { %1261 = vmatpush1.bf16.msra.mxu0 %v1867_v22 }
 0x25a   :  { %1262 = vmatprep.subr.bf16.mxu0 %v1872_v24 }
 0x25d   :  { %1263 = vmatpush1.bf16.msra.mxu0 %v1870_v25 }
 0x25e   :  { %1264 = vmatprep.subr.bf16.mxu0 %v1875_v26 }
 0x261   :  { %1265 = vmatpush1.bf16.msra.mxu0 %v1873_v27 }
 0x262   :  { %1266 = vmatprep.subr.bf16.mxu0 %v1878_v28 }
 0x265   :  { %1267 = vmatpush1.bf16.msra.mxu0 %v1876_v29 }
 0x266   :  { %1268 = vmatprep.subr.bf16.mxu0 %v1881_v30 }
 0x269   :  { %1269 = vmatpush1.bf16.msra.mxu0 %v1879_v31 }
 0x26a   :  { %1270 = vmatprep.subr.bf16.mxu0 %v1884_v32 }
 0x26d   :  { %1271 = vmatpush1.bf16.msra.mxu0 %v1882_v33 }
 0x26e   :  { %1272 = vmatprep.subr.bf16.mxu0 %v1887_v34  ;;  %v1927_v34 = vld [vmem:[#allocation13 + $0x70] sm:$0xff]  }
 0x271   :  { %1273 = vmatpush1.bf16.msra.mxu0 %v1885_v35  ;;  %v1928_v35 = vld [vmem:[#allocation13 + $0x30] sm:$0xff]  }
 0x272   :  { %1274 = vmatprep.subr.bf16.mxu0 %v1890_v36  ;;  %v1929_v36 = vld [vmem:[#allocation13 + $0x78] sm:$0xff]  }
 0x275   :  { %1275 = vmatpush1.bf16.msra.mxu0 %v1888_v37  ;;  %v1930_v37 = vld [vmem:[#allocation13 + $0x38] sm:$0xff]  }
 0x276   :  { %1276 = vmatprep.subr.bf16.mxu0 %v1893_v38  ;;  %v1088_v38 = vld [vmem:[%s2353_s10] sm:$0x3] }
 0x279   :  { %1277 = vmatpush1.bf16.msra.mxu0 %v1891_v39  ;;  %v1093_v39 = vrot.slane %v1088_v38, %v2299_v16  ;;  %v1647_v16 = vld [vmem:[%s2355_s12] ss:$0 sm:$0xff] }
 0x27a   :  { %1278 = vmatprep.subr.bf16.mxu0 %v1896_v40  ;;  %v1097_v40 = vrot.slane %v1088_v38, %v2304_v18 }
 0x27d   :  { %1279 = vmatpush1.bf16.msra.mxu0 %v1894_v41 }
 0x27e   :  { %1280 = vmatprep.subr.bf16.mxu0 %v1899_v42 }
 0x281   :  { %1281 = vmatpush1.bf16.msra.mxu0 %v1897_v43 }
 0x282   :  { %1282 = vmatprep.subr.bf16.mxu0 %v1902_v44 }
 0x285   :  { %1283 = vmatpush1.bf16.msra.mxu0 %v1900_v45 }
 0x286   :  { %1284 = vmatprep.subr.bf16.mxu0 %v1905_v46 }
 0x289   :  { %1285 = vmatpush1.bf16.msra.mxu0 %v1903_v47 }
 0x28a   :  { %1286 = vmatprep.subr.bf16.mxu0 %v1908_v48 }
 0x28d   :  { %1287 = vmatpush1.bf16.msra.mxu0 %v1906_v49 }
 0x28e   :  { %1288 = vmatprep.subr.bf16.mxu0 %v1911_v1 }
 0x291   :  { %1289 = vmatpush1.bf16.msra.mxu0 %v1909_v2 }
 0x292   :  { %1290 = vmatprep.subr.bf16.mxu0 %v1914_v3 }
 0x295   :  { %1291 = vmatpush1.bf16.msra.mxu0 %v1912_v4 }
 0x32b   :  { %v788_v53 = vpop.f32.mrb[4].mxu0 }
 0x32c   :  { %v789_v54 = vadd.f32 %v788_v53, %v587_v51  ;;  %v790_v55 = vpop.f32.mrb[5].mxu0 }
 0x32d   :  { %v791_v56 = vadd.f32 %v790_v55, %v591_v52  ;;  %v792_v57 = vpop.f32.mrb[6].mxu0 }
 0x32e   :  { %vm795_vm4 = vcmp.ge.f32.partialorder %v789_v54, 0.0  ;;  %v797_v58 = vmul.f32 0.01, %v789_v54  ;;  %v793_v59 = vpop.f32.mrb[7].mxu0 }
 0x32f   :  { %vm796_vm5 = vcmp.ge.f32.partialorder %v791_v56, 0.0  ;;  %v798_v60 = vmul.f32 0.01, %v791_v56 }
 0x330   :  { %v799_v61 = vsel %vm795_vm4, %v789_v54, %v797_v58 }
 0x331   :  { %v800_v62 = vsel %vm796_vm5, %v791_v56, %v798_v60  ;;  %v801_v0 = vpack.c.bf16 %v799_v61, %v799_v61 }
 0x332   :  { %v802_v63 = vpack.c.bf16 %v800_v62, %v800_v62 }
 0x334   :  { %1039 = vmatprep.mubr.bf16.mxu1 %v802_v63 }
 0x335   :  { %1040 = vmatmul.mubr.bf16.vlgmr.msra.gmra.mrb[4].mxu1 %v801_v0 }
 0x336   :  { %1665 = vmatpush3.bf16.msra.mxu1 %v1916_v6 }
 0x337   :  { %1666 = vmatprep.subr.bf16.mxu1 %v1917_v7 }
 0x33a   :  { %1667 = vmatpush3.bf16.msra.mxu1 %v1918_v8 }
 0x33b   :  { %1668 = vmatprep.subr.bf16.mxu1 %v1919_v9 }
 0x33e   :  { %1669 = vmatpush3.bf16.msra.mxu1 %v1920_v10 }
 0x33f   :  { %1670 = vmatprep.subr.bf16.mxu1 %v1921_v11 }
 0x342   :  { %1671 = vmatpush3.bf16.msra.mxu1 %v1922_v12 }
 0x343   :  { %1672 = vmatprep.subr.bf16.mxu1 %v1923_v13 }
 0x346   :  { %1673 = vmatpush3.bf16.msra.mxu1 %v1924_v14 }
 0x347   :  { %1674 = vmatprep.subr.bf16.mxu1 %v1925_v15 }
 0x34a   :  { %1675 = vmatpush3.bf16.msra.mxu1 %v1926_v17 }
 0x34b   :  { %1676 = vmatprep.subr.bf16.mxu1 %v1927_v34 }
 0x34e   :  { %1677 = vmatpush3.bf16.msra.mxu1 %v1928_v35 }
 0x34f   :  { %1678 = vmatprep.subr.bf16.mxu1 %v1929_v36 }
 0x352   :  { %1679 = vmatpush3.bf16.msra.mxu1 %v1930_v37 }
 0x408   :  { %v1041_v22 = vpop.f32.mrb[4].mxu1 }
 0x409   :  { %v1042_v23 = vadd.f32 %v1041_v22, %v840_v20  ;;  %v1043_v24 = vpop.f32.mrb[5].mxu1 }
 0x40a   :  { %v1044_v25 = vadd.f32 %v1043_v24, %v844_v21  ;;  %v1045_v26 = vpop.f32.mrb[6].mxu1 }
 0x40b   :  { %vm1048_vm6 = vcmp.ge.f32.partialorder %v1042_v23, 0.0  ;;  %v1050_v27 = vmul.f32 0.01, %v1042_v23  ;;  %v1046_v28 = vpop.f32.mrb[7].mxu1 }
 0x40c   :  { %vm1049_vm7 = vcmp.ge.f32.partialorder %v1044_v25, 0.0  ;;  %v1051_v29 = vmul.f32 0.01, %v1044_v25 }
 0x40d   :  { %v1052_v30 = vsel %vm1048_vm6, %v1042_v23, %v1050_v27 }
 0x40e   :  { %v1053_v31 = vsel %vm1049_vm7, %v1044_v25, %v1051_v29  ;;  %v1054_v33 = vpack.c.bf16 %v1052_v30, %v1052_v30 }
 0x40f   :  { %v1055_v32 = vpack.c.bf16 %v1053_v31, %v1053_v31 }
 0x411   :  { %1292 = vmatprep.mubr.bf16.mxu0 %v1055_v32 }
 0x412   :  { %1293 = vmatmul.mubr.bf16.vlgmr.msra.gmra.mrb[8].mxu0 %v1054_v33 }
 0x4e5   :  { %v1294_v41 = vpop.f32.mrb[8].mxu0 }
 0x4e6   :  { %v1295_v42 = vadd.f32 %v1294_v41, %v1093_v39  ;;  %v1296_v43 = vpop.f32.mrb[9].mxu0 }
 0x4e7   :  { %v1297_v44 = vadd.f32 %v1296_v43, %v1097_v40  ;;  %v1298_v45 = vpop.f32.mrb[10].mxu0 }
 0x4e8   :  { %vm1301_vm8 = vcmp.ge.f32.partialorder %v1295_v42, 0.0  ;;  %v1303_v46 = vmul.f32 0.01, %v1295_v42  ;;  %v1299_v47 = vpop.f32.mrb[11].mxu0 }
 0x4e9   :  { %vm1302_vm9 = vcmp.ge.f32.partialorder %v1297_v44, 0.0  ;;  %v1304_v48 = vmul.f32 0.01, %v1297_v44 }
 0x4ea   :  { %v1305_v49 = vsel %vm1301_vm8, %v1295_v42, %v1303_v46 }
 0x4eb   :  { %v1306_v50 = vsel %vm1302_vm9, %v1297_v44, %v1304_v48  ;;  %v1307_v52 = vpack.c.bf16 %v1305_v49, %v1305_v49 }
 0x4ec   :  { %v1308_v51 = vpack.c.bf16 %v1306_v50, %v1306_v50 }
 0x4ee   :  { %1476 = vmatprep.mubr.bf16.mxu1 %v1308_v51 }
 0x4ef   :  { %1477 = vmatmul.mubr.bf16.vlgmr.msra.gmra.mrb[8].mxu1 %v1307_v52 }
 0x5c2   :  { %v1680_v53 = vpop.f32.mrb[8].mxu1 }
 0x5c3   :  { %v1681_v18 = vpop.f32.mrb[9].mxu1 }
 0x5c4   :  { %v1682_v54 = vadd.f32 %v1681_v18, %v1680_v53  ;;  %v1683_v55 = vpop.f32.mrb[10].mxu1 }
 0x5c5   :  { %v1684_v56 = vpop.f32.mrb[11].mxu1 }
 0x5c6   :  { %v1479_v57 = vadd.f32 %v1682_v54, %v1647_v16 }
 0x5c8   :  { %1484 = vst [vmem:[#allocation14] sm:$0xff] %v1479_v57 }
 0x5c9   :  { %2096 = shalt.err (!%p2093_p4)
}
 0x5ca   :  { %s2097_s12 = scalar_lea.hbm %s2356_s13, 128 }
 0x5cb   :  { %p2098_p5 = scmp.ne.s32.totalorder %s2356_s13, %s2097_s12  ;;  %p2101_p6 = scmp.lt.u32.totalorder %s2097_s12, %s2356_s13 }
 0x5cd   :  { %p2103_p7 = pnand %p2101_p6, %p2098_p5 }
 0x5cf   :  { %2106 = shalt.err (!%p2103_p7)
}
 0x5d0   :  { %1494 = dma.vmem_to_hbm [thread:$0]  %s1492_s5, 128, %s2356_s13, [#allocation4]  }
 0x5d1   :  { %2115 = dma.done.wait [#allocation4], 128  }
 0x5d2   :  { %2116 = vsyncadd [#allocation4], 4294967168 }
 0x5d3   :  { %1498 = vsyncpa [#allocation3], 1 }
 0x5d4   :  { %1499 = vsyncpa [#allocation6], 1 }
 0x5d5   :  { %1500 = vsyncpa [#allocation9], 1 }
 0x5d6   :  { %1501 = vsyncpa [#allocation12], 1 }
 0x5d7   :  { %1502 = vsyncpa [#allocation4], 1 }

</bundles_post_ra>
